<compile_context>
chip_gen: v6e
topology: v6e:2x2x1
jax: 0.10.0
libtpu: 0.0.40
codegen_flags: <defaults>
</compile_context>

<pallas_src>
import math

import jax
import jax.numpy as jnp
from jax.experimental import pallas as pl
from jax.experimental.pallas import tpu as pltpu


def _round_up(x, m):
    return (x + m - 1) // m * m


# Double-buffered (inputs + outputs) block budget.  Conservative enough for
# v7x's 64 MiB physical VMEM; v5e/v6e (128 MiB) have lots of headroom.
_BLOCK_VMEM_BUDGET_BYTES = 16 * 1024 * 1024
_MAX_W_TILE = 8192  # lanes per grid step (amortizes ~0.35us/step overhead)


def _pick_w_tile(W, num_cols, C, G, H, itemsize):
    """Adaptive lane tile: fill the VMEM block budget, multiple of 128."""
    # rows live per lane of a tile (sublane-padded), x2 for double buffering
    rows = num_cols * _round_up(C, 8) + G * _round_up(H, 8)
    per_lane_bytes = 2 * rows * itemsize
    tile = _BLOCK_VMEM_BUDGET_BYTES // max(per_lane_bytes, 1)
    tile = max(128, (tile // 128) * 128)       # lane-dense stores
    tile = min(tile, _MAX_W_TILE)
    return W if W <= tile else tile


# ----------------------------------------------------------------------------
# Pallas kernel: one grid step = one (batch row, W-tile), all groups.
# ----------------------------------------------------------------------------
def _make_grouped_conv1x1_kernel(col_starts, col_counts, num_cols,
                                 input_channels, hidden_size):
    """Kernel args: (x_0..x_{num_cols-1}, w, b, o_0..o_{G-1})."""
    C = input_channels
    H = hidden_size
    use_mxu = C > 1  # C == 1 is a pure broadcast -> keep on the VPU

    def kernel(*refs):
        x_refs = refs[:num_cols]            # each (1, C, w_tile)
        w_ref = refs[num_cols]              # (G*H, C)  VMEM resident
        b_ref = refs[num_cols + 1]          # (G*H, 1)  VMEM resident
        o_refs = refs[num_cols + 2:]        # G x (1, H, w_tile)

        w_all = w_ref[...]
        b_all = b_ref[...]
        for j in range(num_cols):                      # static unroll (dedup'd columns)
            x_j = x_refs[j][0]                         # (C, w_tile)
            for k in range(col_counts[j]):             # groups sharing this column
                g = col_starts[j] + k
                r0 = g * H
                w_g = w_all[r0:r0 + H, :]              # (H, C)  static slice
                b_g = b_all[r0:r0 + H, :]              # (H, 1)
                if use_mxu:
                    # Tiny contraction on the otherwise-idle MXU, f32 accumulate.
                    acc = jnp.dot(w_g, x_j, preferred_element_type=jnp.float32)
                else:
                    acc = w_g[:, 0:1] * x_j[0:1, :]
                    for c in range(1, C):
                        acc = acc + w_g[:, c:c + 1] * x_j[c:c + 1, :]
                acc = acc + b_g
                o_refs[g][0] = acc.astype(o_refs[g].dtype)

    return kernel


def grouped_conv1x1_pallas(input_columns, w_flat, b_flat,
                           col_starts, col_counts, hidden_size):
    """input_columns: list of (N, C, W); w_flat: (G*H, C); b_flat: (G*H, 1).

    Returns a tuple of G arrays of shape (N, H, W) (== torch.chunk of the
    grouped 1x1 conv result) with no extra layout passes before/after the
    kernel.
    """
    num_cols = len(input_columns)
    N, C, W = input_columns[0].shape
    G = sum(col_counts)
    H = hidden_size
    GH = G * H
    out_dtype = input_columns[0].dtype
    itemsize = jnp.dtype(out_dtype).itemsize

    w_tile = _pick_w_tile(W, num_cols, C, G, H, itemsize)
    grid = (N, pl.cdiv(W, w_tile))

    in_specs = [pl.BlockSpec((1, C, w_tile), lambda n, wt: (n, 0, wt))
                for _ in range(num_cols)]
    in_specs += [
        # Constant index maps -> fetched once, kept resident across steps.
        pl.BlockSpec((GH, C), lambda n, wt: (0, 0)),
        pl.BlockSpec((GH, 1), lambda n, wt: (0, 0)),
    ]
    out_specs = tuple(pl.BlockSpec((1, H, w_tile), lambda n, wt: (n, 0, wt))
                      for _ in range(G))
    out_shape = tuple(jax.ShapeDtypeStruct((N, H, W), out_dtype) for _ in range(G))

    kernel = _make_grouped_conv1x1_kernel(col_starts, col_counts, num_cols, C, H)

    # VMEM actually needed: double-buffered in/out blocks + tiny resident consts.
    block_bytes = 2 * (num_cols * _round_up(C, 8) + G * _round_up(H, 8)) * w_tile * itemsize
    const_bytes = 2 * 2 * _round_up(GH, 8) * 128 * 4
    vmem_limit = int(block_bytes * 1.25) + const_bytes + (4 << 20)
    vmem_limit = min(max(vmem_limit, 16 * 1024 * 1024), 48 * 1024 * 1024)

    cost = pl.CostEstimate(
        flops=2 * G * H * C * N * W,
        transcendentals=0,
        bytes_accessed=(num_cols * N * C * W + G * N * H * W) * itemsize
                       + GH * (C + 1) * 4,
    )

    return pl.pallas_call(
        kernel,
        out_shape=out_shape,
        grid_spec=pltpu.PrefetchScalarGridSpec(
            num_scalar_prefetch=0,
            grid=grid,
            in_specs=in_specs,
            out_specs=out_specs,
        ),
        compiler_params=pltpu.CompilerParams(
            dimension_semantics=("parallel", "parallel"),
            vmem_limit_bytes=vmem_limit,
        ),
        cost_estimate=cost,
    )(*input_columns, w_flat, b_flat)


# ----------------------------------------------------------------------------
# Module wrapper (plain-JAX glue; no layout work outside the kernel)
# ----------------------------------------------------------------------------
class ParallelMultipleInputWeightingsComputationPallas:
    def __init__(self, input_channels, hidden_states_size,
                 number_of_single_input_weightings_per_group, key):
        self.input_channels = input_channels
        self.hidden_states_size = hidden_states_size
        self.number_of_single_input_weightings_per_group = list(
            number_of_single_input_weightings_per_group)
        self.num_groups = sum(self.number_of_single_input_weightings_per_group)

        G, C, H = self.num_groups, input_channels, hidden_states_size
        out_channels = H * G

        # Static group<->column bookkeeping (baked into the kernel).
        self.col_counts = tuple(self.number_of_single_input_weightings_per_group)
        starts, s = [], 0
        for n in self.col_counts:
            starts.append(s)
            s += n
        self.col_starts = tuple(starts)
        self.group_to_col = tuple(j for j, n in enumerate(self.col_counts)
                                  for _ in range(n))

        # Deterministic init mirroring nn.Conv1d(C*G, H*G, 1, groups=G) with
        # torch.nn.init.xavier_uniform_ on the weight (shape (out, C, 1)).
        kw, kb = jax.random.split(key)
        fan_in, fan_out = C * 1, out_channels * 1
        bound_w = math.sqrt(6.0 / (fan_in + fan_out))
        weight = jax.random.uniform(
            kw, (out_channels, C, 1), jnp.float32, -bound_w, bound_w)
        # TODO(synk): XavierWeightInitializationCorrectionForGrouping source not
        # provided; approximated as a sqrt(G) rescale for G "virtual layers".
        weight = weight * jnp.sqrt(jnp.float32(G))
        bound_b = 1.0 / math.sqrt(fan_in)
        bias = jax.random.uniform(kb, (out_channels,), jnp.float32, -bound_b, bound_b)

        # Kernel-side layouts: conv out-channel order is group-major (g*H + h).
        self.w_flat = weight.reshape(G * H, C)   # (G*H, C)
        self.b_flat = bias.reshape(G * H, 1)     # (G*H, 1)

        self.use_dropout = False
        # TODO(synk): F.dropout(p=0.2) (use_dropout=True, training) is stochastic;
        # no bitwise PyTorch equivalence — omitted from the kernel path.
        self.clamp_gradients = False  # forward-pass identity (gradient hook only)

    # API-parity helper (original semantics).  NOT used by the Pallas path,
    # which deduplicates instead of materializing the repeated concat.
    def compute_input_column_all_groups(self, input_columns):
        cat_list = []
        for idx, col in enumerate(input_columns):
            cat_list.extend([col] * self.number_of_single_input_weightings_per_group[idx])
        return jnp.concatenate(cat_list, axis=1)

    def compute_result_and_split_into_columns_multiple_groups(self, input_columns):
        # The kernel reads the original (N, C, W) columns and writes the G
        # chunked (N, H, W) outputs directly -> no pre/post transposes.
        return grouped_conv1x1_pallas(
            list(input_columns), self.w_flat, self.b_flat,
            self.col_starts, self.col_counts, self.hidden_states_size)


# ----------------------------------------------------------------------------
# Pure-JAX reference for correctness checking (same math, no Pallas)
# ----------------------------------------------------------------------------
def _reference(module, input_columns):
    G = module.num_groups
    H = module.hidden_states_size
    C = module.input_channels
    w = module.w_flat.reshape(G, H, C)
    b = module.b_flat.reshape(G, H)
    outs = []
    for g in range(G):
        col = input_columns[module.group_to_col[g]]           # (N, C, W)
        o = jnp.einsum('hc,ncw->nhw', w[g], col) + b[g][None, :, None]
        outs.append(o)
    return tuple(outs)


if __name__ == "__main__":
    key = jax.random.PRNGKey(0)
    k_init, k_x = jax.random.split(key)

    # Small, module-consistent shapes (W = 128 keeps the smoke test lane-dense).
    N = 2                          # batch
    C = 4                          # input_channels per column
    W = 128                        # sequence width (Conv1d spatial dim)
    H = 8                          # hidden_states_size
    groups_per_column = [2, 1, 3]  # number_of_single_input_weightings_per_group

    module = ParallelMultipleInputWeightingsComputationPallas(
        input_channels=C, hidden_states_size=H,
        number_of_single_input_weightings_per_group=groups_per_column,
        key=k_init)

    keys = jax.random.split(k_x, len(groups_per_column))
    input_columns = [
        jax.random.normal(keys[i], (N, C, W), jnp.float32)
        for i in range(len(groups_per_column))
    ]

    outs = module.compute_result_and_split_into_columns_multiple_groups(input_columns)
    outs = jax.block_until_ready(outs)

    refs = _reference(module, input_columns)
    for o, r in zip(outs, refs):
        assert o.shape == (N, H, W)
        assert jnp.max(jnp.abs(o - r)) < 1e-4

    print("KERNEL_OK")
</pallas_src>

<mosaic_0001>
module attributes {stable_mosaic.version = 11 : i64} {
  func.func @kernel(%arg0: i32, %arg1: i32, %arg2: memref<1x4x128xf32, #tpu.memory_space<vmem>>, %arg3: memref<1x4x128xf32, #tpu.memory_space<vmem>>, %arg4: memref<1x4x128xf32, #tpu.memory_space<vmem>>, %arg5: memref<48x4xf32, #tpu.memory_space<vmem>>, %arg6: memref<48x1xf32, #tpu.memory_space<vmem>>, %arg7: memref<1x8x128xf32, #tpu.memory_space<vmem>>, %arg8: memref<1x8x128xf32, #tpu.memory_space<vmem>>, %arg9: memref<1x8x128xf32, #tpu.memory_space<vmem>>, %arg10: memref<1x8x128xf32, #tpu.memory_space<vmem>>, %arg11: memref<1x8x128xf32, #tpu.memory_space<vmem>>, %arg12: memref<1x8x128xf32, #tpu.memory_space<vmem>>) attributes {dimension_semantics = [#tpu.dimension_semantics<parallel>, #tpu.dimension_semantics<parallel>], iteration_bounds = array<i64: 2, 1>, scalar_prefetch = 0 : i64, scratch_operands = 0 : i64, tpu.core_type = #tpu.core_type<tc>, window_params = [{transform_indices = @transform_0, window_bounds = array<i64: 1, 4, 128>}, {transform_indices = @transform_1, window_bounds = array<i64: 1, 4, 128>}, {transform_indices = @transform_2, window_bounds = array<i64: 1, 4, 128>}, {pipeline_mode = #tpu.pipeline_mode<synchronous>, transform_indices = @transform_3, window_bounds = array<i64: 48, 4>}, {pipeline_mode = #tpu.pipeline_mode<synchronous>, transform_indices = @transform_4, window_bounds = array<i64: 48, 1>}, {transform_indices = @transform_5, window_bounds = array<i64: 1, 8, 128>}, {transform_indices = @transform_6, window_bounds = array<i64: 1, 8, 128>}, {transform_indices = @transform_7, window_bounds = array<i64: 1, 8, 128>}, {transform_indices = @transform_8, window_bounds = array<i64: 1, 8, 128>}, {transform_indices = @transform_9, window_bounds = array<i64: 1, 8, 128>}, {transform_indices = @transform_10, window_bounds = array<i64: 1, 8, 128>}]} {
    %c0 = arith.constant 0 : index
    %c0_0 = arith.constant 0 : index
    %0 = vector.load %arg5[%c0, %c0_0] : memref<48x4xf32, #tpu.memory_space<vmem>>, vector<48x4xf32>
    %c0_1 = arith.constant 0 : index
    %c0_2 = arith.constant 0 : index
    %1 = vector.load %arg6[%c0_1, %c0_2] : memref<48x1xf32, #tpu.memory_space<vmem>>, vector<48x1xf32>
    %c0_3 = arith.constant 0 : index
    %c0_4 = arith.constant 0 : index
    %c0_5 = arith.constant 0 : index
    %2 = vector.load %arg2[%c0_3, %c0_4, %c0_5] : memref<1x4x128xf32, #tpu.memory_space<vmem>>, vector<1x4x128xf32>
    %3 = vector.shape_cast %2 : vector<1x4x128xf32> to vector<4x128xf32>
    %4 = vector.extract_strided_slice %0 {offsets = [0, 0], sizes = [8, 4], strides = [1, 1]} : vector<48x4xf32> to vector<8x4xf32>
    %5 = vector.extract_strided_slice %1 {offsets = [0, 0], sizes = [8, 1], strides = [1, 1]} : vector<48x1xf32> to vector<8x1xf32>
    %cst = arith.constant dense<0.000000e+00> : vector<8x128xf32>
    %6 = tpu.matmul %4, %3, %cst {dimension_numbers = #tpu.dot_dimension_numbers<[1], [0], [0], [1], [0, 0, 1, 1], [], []>} : vector<8x4xf32>, vector<4x128xf32>, vector<8x128xf32> -> vector<8x128xf32>
    %7 = vector.broadcast %5 : vector<8x1xf32> to vector<8x128xf32>
    %8 = arith.addf %6, %7 : vector<8x128xf32>
    %c0_6 = arith.constant 0 : index
    %c0_7 = arith.constant 0 : index
    %c0_8 = arith.constant 0 : index
    %9 = vector.load %arg7[%c0_6, %c0_7, %c0_8] : memref<1x8x128xf32, #tpu.memory_space<vmem>>, vector<1x8x128xf32>
    %10 = vector.shape_cast %9 : vector<1x8x128xf32> to vector<8x128xf32>
    %11 = vector.shape_cast %8 : vector<8x128xf32> to vector<1x8x128xf32>
    tpu.vector_store %arg7[%c0_6, %c0_7, %c0_8], %11 {strides = array<i32>} : memref<1x8x128xf32, #tpu.memory_space<vmem>>, vector<1x8x128xf32>,
    %12 = vector.extract_strided_slice %0 {offsets = [8, 0], sizes = [8, 4], strides = [1, 1]} : vector<48x4xf32> to vector<8x4xf32>
    %13 = vector.extract_strided_slice %1 {offsets = [8, 0], sizes = [8, 1], strides = [1, 1]} : vector<48x1xf32> to vector<8x1xf32>
    %cst_9 = arith.constant dense<0.000000e+00> : vector<8x128xf32>
    %14 = tpu.matmul %12, %3, %cst_9 {dimension_numbers = #tpu.dot_dimension_numbers<[1], [0], [0], [1], [0, 0, 1, 1], [], []>} : vector<8x4xf32>, vector<4x128xf32>, vector<8x128xf32> -> vector<8x128xf32>
    %15 = vector.broadcast %13 : vector<8x1xf32> to vector<8x128xf32>
    %16 = arith.addf %14, %15 : vector<8x128xf32>
    %c0_10 = arith.constant 0 : index
    %c0_11 = arith.constant 0 : index
    %c0_12 = arith.constant 0 : index
    %17 = vector.load %arg8[%c0_10, %c0_11, %c0_12] : memref<1x8x128xf32, #tpu.memory_space<vmem>>, vector<1x8x128xf32>
    %18 = vector.shape_cast %17 : vector<1x8x128xf32> to vector<8x128xf32>
    %19 = vector.shape_cast %16 : vector<8x128xf32> to vector<1x8x128xf32>
    tpu.vector_store %arg8[%c0_10, %c0_11, %c0_12], %19 {strides = array<i32>} : memref<1x8x128xf32, #tpu.memory_space<vmem>>, vector<1x8x128xf32>,
    %c0_13 = arith.constant 0 : index
    %c0_14 = arith.constant 0 : index
    %c0_15 = arith.constant 0 : index
    %20 = vector.load %arg3[%c0_13, %c0_14, %c0_15] : memref<1x4x128xf32, #tpu.memory_space<vmem>>, vector<1x4x128xf32>
    %21 = vector.shape_cast %20 : vector<1x4x128xf32> to vector<4x128xf32>
    %22 = vector.extract_strided_slice %0 {offsets = [16, 0], sizes = [8, 4], strides = [1, 1]} : vector<48x4xf32> to vector<8x4xf32>
    %23 = vector.extract_strided_slice %1 {offsets = [16, 0], sizes = [8, 1], strides = [1, 1]} : vector<48x1xf32> to vector<8x1xf32>
    %cst_16 = arith.constant dense<0.000000e+00> : vector<8x128xf32>
    %24 = tpu.matmul %22, %21, %cst_16 {dimension_numbers = #tpu.dot_dimension_numbers<[1], [0], [0], [1], [0, 0, 1, 1], [], []>} : vector<8x4xf32>, vector<4x128xf32>, vector<8x128xf32> -> vector<8x128xf32>
    %25 = vector.broadcast %23 : vector<8x1xf32> to vector<8x128xf32>
    %26 = arith.addf %24, %25 : vector<8x128xf32>
    %c0_17 = arith.constant 0 : index
    %c0_18 = arith.constant 0 : index
    %c0_19 = arith.constant 0 : index
    %27 = vector.load %arg9[%c0_17, %c0_18, %c0_19] : memref<1x8x128xf32, #tpu.memory_space<vmem>>, vector<1x8x128xf32>
    %28 = vector.shape_cast %27 : vector<1x8x128xf32> to vector<8x128xf32>
    %29 = vector.shape_cast %26 : vector<8x128xf32> to vector<1x8x128xf32>
    tpu.vector_store %arg9[%c0_17, %c0_18, %c0_19], %29 {strides = array<i32>} : memref<1x8x128xf32, #tpu.memory_space<vmem>>, vector<1x8x128xf32>,
    %c0_20 = arith.constant 0 : index
    %c0_21 = arith.constant 0 : index
    %c0_22 = arith.constant 0 : index
    %30 = vector.load %arg4[%c0_20, %c0_21, %c0_22] : memref<1x4x128xf32, #tpu.memory_space<vmem>>, vector<1x4x128xf32>
    %31 = vector.shape_cast %30 : vector<1x4x128xf32> to vector<4x128xf32>
    %32 = vector.extract_strided_slice %0 {offsets = [24, 0], sizes = [8, 4], strides = [1, 1]} : vector<48x4xf32> to vector<8x4xf32>
    %33 = vector.extract_strided_slice %1 {offsets = [24, 0], sizes = [8, 1], strides = [1, 1]} : vector<48x1xf32> to vector<8x1xf32>
    %cst_23 = arith.constant dense<0.000000e+00> : vector<8x128xf32>
    %34 = tpu.matmul %32, %31, %cst_23 {dimension_numbers = #tpu.dot_dimension_numbers<[1], [0], [0], [1], [0, 0, 1, 1], [], []>} : vector<8x4xf32>, vector<4x128xf32>, vector<8x128xf32> -> vector<8x128xf32>
    %35 = vector.broadcast %33 : vector<8x1xf32> to vector<8x128xf32>
    %36 = arith.addf %34, %35 : vector<8x128xf32>
    %c0_24 = arith.constant 0 : index
    %c0_25 = arith.constant 0 : index
    %c0_26 = arith.constant 0 : index
    %37 = vector.load %arg10[%c0_24, %c0_25, %c0_26] : memref<1x8x128xf32, #tpu.memory_space<vmem>>, vector<1x8x128xf32>
    %38 = vector.shape_cast %37 : vector<1x8x128xf32> to vector<8x128xf32>
    %39 = vector.shape_cast %36 : vector<8x128xf32> to vector<1x8x128xf32>
    tpu.vector_store %arg10[%c0_24, %c0_25, %c0_26], %39 {strides = array<i32>} : memref<1x8x128xf32, #tpu.memory_space<vmem>>, vector<1x8x128xf32>,
    %40 = vector.extract_strided_slice %0 {offsets = [32, 0], sizes = [8, 4], strides = [1, 1]} : vector<48x4xf32> to vector<8x4xf32>
    %41 = vector.extract_strided_slice %1 {offsets = [32, 0], sizes = [8, 1], strides = [1, 1]} : vector<48x1xf32> to vector<8x1xf32>
    %cst_27 = arith.constant dense<0.000000e+00> : vector<8x128xf32>
    %42 = tpu.matmul %40, %31, %cst_27 {dimension_numbers = #tpu.dot_dimension_numbers<[1], [0], [0], [1], [0, 0, 1, 1], [], []>} : vector<8x4xf32>, vector<4x128xf32>, vector<8x128xf32> -> vector<8x128xf32>
    %43 = vector.broadcast %41 : vector<8x1xf32> to vector<8x128xf32>
    %44 = arith.addf %42, %43 : vector<8x128xf32>
    %c0_28 = arith.constant 0 : index
    %c0_29 = arith.constant 0 : index
    %c0_30 = arith.constant 0 : index
    %45 = vector.load %arg11[%c0_28, %c0_29, %c0_30] : memref<1x8x128xf32, #tpu.memory_space<vmem>>, vector<1x8x128xf32>
    %46 = vector.shape_cast %45 : vector<1x8x128xf32> to vector<8x128xf32>
    %47 = vector.shape_cast %44 : vector<8x128xf32> to vector<1x8x128xf32>
    tpu.vector_store %arg11[%c0_28, %c0_29, %c0_30], %47 {strides = array<i32>} : memref<1x8x128xf32, #tpu.memory_space<vmem>>, vector<1x8x128xf32>,
    %48 = vector.extract_strided_slice %0 {offsets = [40, 0], sizes = [8, 4], strides = [1, 1]} : vector<48x4xf32> to vector<8x4xf32>
    %49 = vector.extract_strided_slice %1 {offsets = [40, 0], sizes = [8, 1], strides = [1, 1]} : vector<48x1xf32> to vector<8x1xf32>
    %cst_31 = arith.constant dense<0.000000e+00> : vector<8x128xf32>
    %50 = tpu.matmul %48, %31, %cst_31 {dimension_numbers = #tpu.dot_dimension_numbers<[1], [0], [0], [1], [0, 0, 1, 1], [], []>} : vector<8x4xf32>, vector<4x128xf32>, vector<8x128xf32> -> vector<8x128xf32>
    %51 = vector.broadcast %49 : vector<8x1xf32> to vector<8x128xf32>
    %52 = arith.addf %50, %51 : vector<8x128xf32>
    %c0_32 = arith.constant 0 : index
    %c0_33 = arith.constant 0 : index
    %c0_34 = arith.constant 0 : index
    %53 = vector.load %arg12[%c0_32, %c0_33, %c0_34] : memref<1x8x128xf32, #tpu.memory_space<vmem>>, vector<1x8x128xf32>
    %54 = vector.shape_cast %53 : vector<1x8x128xf32> to vector<8x128xf32>
    %55 = vector.shape_cast %52 : vector<8x128xf32> to vector<1x8x128xf32>
    tpu.vector_store %arg12[%c0_32, %c0_33, %c0_34], %55 {strides = array<i32>} : memref<1x8x128xf32, #tpu.memory_space<vmem>>, vector<1x8x128xf32>,
    return
  }
  func.func @transform_0(%arg0: i32, %arg1: i32) -> (i32, i32, i32) {
    %c0_i32 = arith.constant 0 : i32
    %c0_i32_0 = arith.constant 0 : i32
    return %arg0, %c0_i32, %arg1 : i32, i32, i32
  }
  func.func @transform_1(%arg0: i32, %arg1: i32) -> (i32, i32, i32) {
    %c0_i32 = arith.constant 0 : i32
    %c0_i32_0 = arith.constant 0 : i32
    return %arg0, %c0_i32, %arg1 : i32, i32, i32
  }
  func.func @transform_2(%arg0: i32, %arg1: i32) -> (i32, i32, i32) {
    %c0_i32 = arith.constant 0 : i32
    %c0_i32_0 = arith.constant 0 : i32
    return %arg0, %c0_i32, %arg1 : i32, i32, i32
  }
  func.func @transform_3(%arg0: i32, %arg1: i32) -> (i32, i32) {
    %c0_i32 = arith.constant 0 : i32
    %c0_i32_0 = arith.constant 0 : i32
    %c0_i32_1 = arith.constant 0 : i32
    return %c0_i32, %c0_i32_0 : i32, i32
  }
  func.func @transform_4(%arg0: i32, %arg1: i32) -> (i32, i32) {
    %c0_i32 = arith.constant 0 : i32
    %c0_i32_0 = arith.constant 0 : i32
    %c0_i32_1 = arith.constant 0 : i32
    return %c0_i32, %c0_i32_0 : i32, i32
  }
  func.func @transform_5(%arg0: i32, %arg1: i32) -> (i32, i32, i32) {
    %c0_i32 = arith.constant 0 : i32
    %c0_i32_0 = arith.constant 0 : i32
    return %arg0, %c0_i32, %arg1 : i32, i32, i32
  }
  func.func @transform_6(%arg0: i32, %arg1: i32) -> (i32, i32, i32) {
    %c0_i32 = arith.constant 0 : i32
    %c0_i32_0 = arith.constant 0 : i32
    return %arg0, %c0_i32, %arg1 : i32, i32, i32
  }
  func.func @transform_7(%arg0: i32, %arg1: i32) -> (i32, i32, i32) {
    %c0_i32 = arith.constant 0 : i32
    %c0_i32_0 = arith.constant 0 : i32
    return %arg0, %c0_i32, %arg1 : i32, i32, i32
  }
  func.func @transform_8(%arg0: i32, %arg1: i32) -> (i32, i32, i32) {
    %c0_i32 = arith.constant 0 : i32
    %c0_i32_0 = arith.constant 0 : i32
    return %arg0, %c0_i32, %arg1 : i32, i32, i32
  }
  func.func @transform_9(%arg0: i32, %arg1: i32) -> (i32, i32, i32) {
    %c0_i32 = arith.constant 0 : i32
    %c0_i32_0 = arith.constant 0 : i32
    return %arg0, %c0_i32, %arg1 : i32, i32, i32
  }
  func.func @transform_10(%arg0: i32, %arg1: i32) -> (i32, i32, i32) {
    %c0_i32 = arith.constant 0 : i32
    %c0_i32_0 = arith.constant 0 : i32
    return %arg0, %c0_i32, %arg1 : i32, i32, i32
  }
}

</mosaic_0001>

<bundles_post_ra>
// kernel: tpu_custom_call.1
= control target key start
LH: loop header
LB: loop body
LE: loop exit
PB: predicated region body
PF: predicated region fallthrough
CT: control target
= control target key end

     0   :  { %s2178_s0 = inlined_call_operand.vmem [shape: f32[2,4,128], index: 0, kind: input, shape index: {}]   ;;  %s2179_s1 = inlined_call_operand.vmem [shape: f32[2,4,128], index: 1, kind: input, shape index: {}]   ;;  %s2180_s2 = inlined_call_operand.vmem [shape: f32[2,4,128], index: 2, kind: input, shape index: {}]   ;;  %s2181_s3 = inlined_call_operand.vmem [shape: f32[48,4], index: 3, kind: input, shape index: {}]   ;;  %s2182_s4 = inlined_call_operand.vmem [shape: f32[48,1], index: 4, kind: input, shape index: {}]   ;;  %s2183_s5 = inlined_call_operand.hbm [shape: f32[2,8,128], index: 5, kind: output, shape index: {0}]   ;;  %s2184_s6 = inlined_call_operand.hbm [shape: f32[2,8,128], index: 6, kind: output, shape index: {1}]   ;;  %s2185_s7 = inlined_call_operand.hbm [shape: f32[2,8,128], index: 7, kind: output, shape index: {2}]   ;;  %s2186_s8 = inlined_call_operand.hbm [shape: f32[2,8,128], index: 8, kind: output, shape index: {3}]   ;;  %s2187_s9 = inlined_call_operand.hbm [shape: f32[2,8,128], index: 9, kind: output, shape index: {4}]   ;;  %s2188_s10 = inlined_call_operand.hbm [shape: f32[2,8,128], index: 10, kind: output, shape index: {5}]  }
   0x1   :  { %2199 = sst [smem:[#allocation21_spill]] %s2178_s0 }
   0x2   :  { %2200 = sst [smem:[#allocation22_spill]] %s2179_s1 }
   0x3   :  { %2201 = sst [smem:[#allocation23_spill]] %s2180_s2 }
   0x4   :  { %2202 = sst [smem:[#allocation24_spill]] %s2181_s3 }
   0x5   :  { %2203 = sst [smem:[#allocation25_spill]] %s2182_s4 }
   0x6   :  { %16 = vsyncpa [#allocation3], 0 }
   0x7   :  { %18 = vsyncpa [#allocation3 + $0x1], 0 }
   0x8   :  { %19 = vsyncpa [#allocation5], 0 }
   0x9   :  { %21 = vsyncpa [#allocation5 + $0x1], 0 }
   0xa   :  { %22 = vsyncpa [#allocation8], 0 }
   0xb   :  { %24 = vsyncpa [#allocation8 + $0x1], 0 }
   0xc   :  { %25 = vsyncpa [#allocation11], 0 }
   0xd   :  { %27 = vsyncpa [#allocation11 + $0x1], 0  ;;  %s1812_s13 = smov 0   ;;  %s1814_s14 = smov 0  }
   0xe   :  { %s1816_s15 = smov 0   ;;  %s1818_s16 = smov 0  }
   0xf   :  { %s1820_s17 = smov 0   ;;  %s1822_s18 = smov 0  }
  0x10 LB: > { %2204 = sst [smem:[#allocation16_spill]] %s1730_s14  ;;  %s2190_s19 = sadd.s32 4294967295, %s1746_s18   ;;  %s1746_s18 = sphi %s1822_s18, %s33_s18   ;;  %s1742_s17 = sphi %s1820_s17, %s2228_s17   ;;  %s1738_s16 = sphi %s1818_s16, %s2227_s16   ;;  %s1734_s15 = sphi %s1816_s15, %s2226_s15   ;;  %s1730_s14 = sphi %s1814_s14, %s2225_s14   ;;  %s1726_s13 = sphi %s1812_s13, %s2224_s13  }
  0x11   : > { %2205 = sst [smem:[#allocation17_spill]] %s1734_s15  ;;  %s2189_s20 = sadd.s32 4294967294, %s1746_s18  }
  0x12   : > { %2206 = sst [smem:[#allocation18_spill]] %s1742_s17  ;;  %s45_s21 = sadd.s32 1, %s1742_s17 }
  0x13   : > { %s180_s22 = sadd.s32 1, %s1734_s15  ;;  %p47_p0 = scmp.ge.s32.totalorder %s45_s21, 2 }
  0x14   : > { %p190_p1 = scmp.ne.s32.totalorder %s1734_s15, %s1730_s14  ;;  %p191_p2 = scmp.eq.s32.totalorder %s2190_s19, 1 }
  0x15   : > { %p196_p3 = scmp.ne.s32.totalorder %s1730_s14, %s1726_s13  ;;  %s2230_s21 = smov (%p47_p0, %s45_s21), 0 }
  0x16   : > { %2207 = sst [smem:[#allocation19_spill]] %s2230_s21  ;;  %p1854_p4 = por %p191_p2, %p190_p1 }
  0x17   : > { %p197_p5 = scmp.eq.s32.totalorder %s2189_s20, 1  ;;  %s175_s24 = ssub.s32 %s1742_s17, %s2230_s21 }
  0x18   : > { %p1365_p6 = scmp.ge.s32.totalorder %s1746_s18, 1  ;;  %p178_p7 = scmp.eq.s32.totalorder %s175_s24, 0 }
  0x19   : > { %p1863_p8 = por %p197_p5, %p196_p3  ;;  %p391_p9 = scmp.lt.s32.totalorder %s1746_s18, 3 }
  0x1a   : > { %s1869_s26 = scalar_select %p178_p7, %s1734_s15, %s180_s22  }
  0x1b   : > { %p392_p10 = pnand %p1365_p6, %p391_p9 }
  0x1c   : > { %2210 = sst [smem:[#allocation20_spill]] %s1869_s26  ;;  %p470_p11 = scmp.lt.s32.totalorder (!%p392_p10), %s1738_s16, 1 }
  0x1d   : > { %395 = sbr.rel (%p392_p10) target bundleno = 367 (0x16f), region = 40  ;;  %s2211_s4 = sld [smem:[#allocation25_spill]] (!%p392_p10) }
  0x1e   : > { %s2212_s0 = sld [smem:[#allocation21_spill]] (!%p392_p10)  ;;  %s2216_s24 = sadd.s32 (!%p392_p10), 4294967295, %s1746_s18  }
  0x1f   : > { %s2213_s3 = sld [smem:[#allocation24_spill]] (!%p392_p10)  ;;  %s1950_s28 = sand.u32 (!%p392_p10), 1, %s2216_s24  }
  0x20   : > { %s2214_s1 = sld [smem:[#allocation22_spill]] (!%p392_p10)  ;;  %s1955_s29 = sshll.u32 (!%p392_p10), %s1738_s16, 7 }
  0x21   : > { %s2215_s2 = sld [smem:[#allocation23_spill]] (!%p392_p10)  ;;  %s1964_s17 = scalar_lea.hbm (!%p392_p10), %s2184_s6, %s1955_s29 }
  0x22   : > { %v1748_v0 = vmov 0.0   ;;  %s471_s27 = scalar_select %p470_p11, %s1738_s16, 1  ;;  %vm1749_vm0 = vmmov 0   ;;  %v1750_v2 = vmov 0   ;;  %vm513_vm1 = vcmask 1043456  }
  0x23   : > { %1413 = vmatprep.subr.mxu0 %v1748_v0  ;;  %1418 = vmatprep.subr.mxu1 %v1748_v0  ;;  %v498_v1 = vld [vmem:[%s2211_s4 + $0x8] sm:$0xff]  ;;  %v497_v3 = vld [vmem:[%s2211_s4] sm:$0xff]  ;;  %vm509_vm2 = vcmask 31744   ;;  %v500_v13 = vld [vmem:[%s2211_s4 + $0x18] sm:$0xff]  ;;  %s1751_s11 = smov [#allocation4]  }
  0x24   : > { %1415 = vmatprep.mubr.msk.f32.mxu0 %vm1749_vm0, %v1748_v0  ;;  %1420 = vmatprep.mubr.msk.f32.mxu1 %vm1749_vm0, %v1748_v0  ;;  %s1372_s12 = sshll.u32 %s471_s27, 2  ;;  %v499_v14 = vld [vmem:[%s2211_s4 + $0x10] sm:$0xff]  ;;  %v501_v15 = vld [vmem:[%s2211_s4 + $0x20] sm:$0xff]  ;;  %v502_v16 = vld [vmem:[%s2211_s4 + $0x28] sm:$0xff]  ;;  %s1532_s19 = sshll.u32 %s1751_s11, 4  ;;  %s1533_s19 = int_to_ptr.vmem [resolvable:$false] %s1532_s19 }
  0x25   : > { %1527 = vset.pattern.permute.xlu1 %v1750_v2  ;;  %1526 = vset.pattern.permute.xlu0 %v1750_v2  ;;  %s476_s20 = scalar_lea.vmem %s2212_s0, %s1372_s12  ;;  %v491_v4 = vld [vmem:[%s2213_s3] sm:$0xff]  ;;  %v492_v5 = vld [vmem:[%s2213_s3 + $0x8] sm:$0xff]  ;;  %v493_v9 = vld [vmem:[%s2213_s3 + $0x10] sm:$0xff]  ;;  %s1976_s0 = scalar_lea.hbm %s2183_s5, %s1955_s29 }
  0x26   : > { %590 = vperm.xlu0 %1526, %v498_v1   ;;  %506 = vperm.xlu1 %1527, %v497_v3   ;;  %s483_s27 = scalar_lea.vmem %s2214_s1, %s1372_s12  ;;  %v503_v6 = vld [vmem:[%s476_s20] sm:$0xf]  ;;  %v494_v10 = vld [vmem:[%s2213_s3 + $0x18] sm:$0xff]  ;;  %v496_v12 = vld [vmem:[%s2213_s3 + $0x28] sm:$0xff]  ;;  %s1937_s20 = sand.u32 1, %s1730_s14  }
  0x27   : > { %s490_s15 = scalar_lea.vmem %s2215_s2, %s1372_s12  ;;  %1414 = vmatpush3.msk.msra.mxu0 %vm513_vm1, %v503_v6  ;;  %1419 = vmatpush3.msk.msra.mxu1 %vm513_vm1, %v503_v6  ;;  %v667_v7 = vld [vmem:[%s483_s27] sm:$0xf]  ;;  %s1940_s21 = sshll.u32 %s1937_s20, 3 }
  0x28   : > { %v750_v8 = vld [vmem:[%s490_s15] sm:$0xf]  ;;  %1416 = vmatmul.mubr.msk.f32.vlgmr.msra.gmra.mxu0 %vm509_vm2, %v491_v4  ;;  %1421 = vmatmul.mubr.msk.f32.vlgmr.msra.gmra.mxu1 %vm509_vm2, %v492_v5  ;;  %s2194_s15 = scalar_lea.vmem [#allocation6], %s1940_s21  ;;  %s2195_s12 = scalar_lea.vmem [#allocation9], %s1940_s21 }
  0x29   : > { %1423 = vmatprep.subr.mxu0 %v1748_v0  ;;  %1428 = vmatprep.subr.mxu1 %v1748_v0  ;;  %v495_v11 = vld [vmem:[%s2213_s3 + $0x20] sm:$0xff]  ;;  %s1059_s26 = sshll.u32 %s2194_s15, 4  ;;  %s1087_s22 = sshll.u32 %s2195_s12, 4  ;;  %s1952_s26 = int_to_ptr.vmem [resolvable:$true] %s1059_s26  ;;  %s1958_s22 = int_to_ptr.vmem [resolvable:$true] %s1087_s22 }
  0x2a   : > { %1424 = vmatpush3.msk.msra.mxu0 %vm513_vm1, %v667_v7  ;;  %1429 = vmatpush3.msk.msra.mxu1 %vm513_vm1, %v750_v8  ;;  %s441_s30 = scalar_lea.vmem [#allocation4], %s1940_s21  ;;  %s434_s15 = scalar_lea.vmem [#allocation2], %s1940_s21 }
  0x2b   : > { %1425 = vmatprep.mubr.msk.f32.mxu0 %vm1749_vm0, %v1748_v0  ;;  %1430 = vmatprep.mubr.msk.f32.mxu1 %vm1749_vm0, %v1748_v0  ;;  %s1045_s27 = sshll.u32 %s441_s30, 4  ;;  %s1031_s12 = sshll.u32 %s434_s15, 4  ;;  %s1967_s27 = int_to_ptr.vmem [resolvable:$true] %s1045_s27  ;;  %s1978_s12 = int_to_ptr.vmem [resolvable:$true] %s1031_s12 }
  0x2c   : > { %1426 = vmatmul.mubr.msk.f32.vlgmr.msra.gmra.mxu0 %vm509_vm2, %v493_v9  ;;  %1431 = vmatmul.mubr.msk.f32.vlgmr.msra.gmra.mxu1 %vm509_vm2, %v494_v10  ;;  %s2196_s16 = scalar_lea.vmem [#allocation7], %s1940_s21  ;;  %s1984_s2 = scalar_lea.hbm %s2186_s8, %s1955_s29 }
  0x2d   : > { %1433 = vmatprep.subr.mxu0 %v1748_v0  ;;  %1438 = vmatprep.subr.mxu1 %v1748_v0  ;;  %s1073_s24 = sshll.u32 %s2196_s16, 4  ;;  %s1528_s4 = scalar_lea.vmem %s1967_s27, 128  ;;  %s1986_s24 = int_to_ptr.vmem [resolvable:$true] %s1073_s24 }
  0x2e   : > { %1434 = vmatpush3.msk.msra.mxu0 %vm513_vm1, %v750_v8  ;;  %1439 = vmatpush3.msk.msra.mxu1 %vm513_vm1, %v750_v8  ;;  %p1529_p12 = scmp.ne.s32.totalorder %s1967_s27, %s1528_s4  ;;  %p1535_p1 = scmp.lt.s32.totalorder %s1967_s27, %s1533_s19 }
  0x2f   : > { %1435 = vmatprep.mubr.msk.f32.mxu0 %vm1749_vm0, %v1748_v0  ;;  %1440 = vmatprep.mubr.msk.f32.mxu1 %vm1749_vm0, %v1748_v0 }
  0x30   : > { %1436 = vmatmul.mubr.msk.f32.vlgmr.msra.gmra.mxu0 %vm509_vm2, %v495_v11  ;;  %1441 = vmatmul.mubr.msk.f32.vlgmr.msra.gmra.mxu1 %vm509_vm2, %v496_v12  ;;  %p1530_p13 = pnand %p1529_p12, %p1854_p4 }
  0x31   : > { %753 = vperm.xlu0 %1526, %v500_v13   ;;  %670 = vperm.xlu1 %1527, %v499_v14  }
  0x32   : > { %p1531_p0 = pneg %p1530_p13 }
  0x35   : > { %835 = vperm.xlu0 %1526, %v501_v15   ;;  %914 = vperm.xlu1 %1527, %v502_v16  }
  0xa1   : > { %v591_v17 = vpop.permute.xlu0 %590  ;;  %v507_v18 = vpop.permute.xlu1 %506 }
  0xac   : > { %v754_v21 = vpop.permute.xlu0 %753  ;;  %v671_v22 = vpop.permute.xlu1 %670 }
  0xe8   : > { %v583_v19 = vpop.f32.mrf.mxu0  ;;  %v662_v20 = vpop.f32.mrf.mxu1 }
  0xe9   : > { %v584_v23 = vadd.f32 %v583_v19, %v507_v18  ;;  %v663_v24 = vadd.f32 %v662_v20, %v591_v17 }
  0xea   : > { %v1417_v25 = vpop.f32.mrf.mxu0  ;;  %v1422_v26 = vpop.f32.mrf.mxu1 }
  0xeb   : > { %587 = vst [vmem:[%s434_s15] sm:$0xff] %v584_v23  ;;  %666 = vst [vmem:[%s441_s30] sm:$0xff] %v663_v24  ;;  %s1534_s15 = scalar_lea.vmem %s1533_s19, 256 }
  0xec   : > { %v745_v27 = vpop.f32.mrf.mxu0  ;;  %v828_v28 = vpop.f32.mrf.mxu1  ;;  %p1536_p2 = scmp.lt.s32.totalorder %s1534_s15, %s1528_s4 }
  0xee   : > { %p1537_p3 = por %p1536_p2, %p1535_p1 }
  0xf0   : > { %p1538_p5 = pnand %p1537_p3, %p1531_p0 }
  0xf2   : > { %1541 = shalt.err (!%p1538_p5)
}
  0xf3   : > { %s1542_s1 = scalar_lea.hbm %s1964_s17, 128  ;;  %s1546_s11 = scalar_lea.hbm %s2184_s6, 256 }
  0xf4   : > { %p1543_p6 = scmp.ne.s32.totalorder %s1964_s17, %s1542_s1  ;;  %p1547_p10 = scmp.lt.s32.totalorder %s1964_s17, %s2184_s6 }
  0xf5   : > { %p1548_p11 = scmp.lt.s32.totalorder %s1546_s11, %s1542_s1 }
  0xf6   : > { %p1544_p7 = pnand %p1543_p6, %p1854_p4 }
  0xf7   : > { %p1549_p12 = por %p1548_p11, %p1547_p10 }
  0xf8   : > { %p1545_p9 = pneg %p1544_p7 }
  0xfa   : > { %p1550_p13 = pnand %p1549_p12, %p1545_p9 }
  0xfc   : > { %1553 = shalt.err (!%p1550_p13)
}
  0xfd   : > { %s2217_s4 = scalar_lea.sflag [#allocation5], %s1950_s28  ;;  %v746_v29 = vadd.f32 %v745_v27, %v671_v22  ;;  %v829_v30 = vadd.f32 %v828_v28, %v754_v21  ;;  %s992_s3 = scalar_lea.sflag [#allocation3], %s1937_s20 }
  0xfe   : > { %1444 = dma.vmem_to_hbm [thread:$0]  (%p1854_p4), %s1967_s27, 128, %s1964_s17, %s2217_s4  }
  0xff   : > { %s1554_s14 = scalar_lea.vmem %s1978_s12, 128  ;;  %s1752_s19 = smov [#allocation2]  }
 0x100   : > { %p1555_p0 = scmp.ne.s32.totalorder %s1978_s12, %s1554_s14  ;;  %s1558_s15 = sshll.u32 %s1752_s19, 4  ;;  %s1559_s15 = int_to_ptr.vmem [resolvable:$false] %s1558_s15 }
 0x101   : > { %s1560_s1 = scalar_lea.vmem %s1559_s15, 256  ;;  %p1561_p3 = scmp.lt.s32.totalorder %s1978_s12, %s1559_s15 }
 0x102   : > { %p1556_p1 = pnand %p1555_p0, %p1854_p4  ;;  %p1562_p5 = scmp.lt.s32.totalorder %s1560_s1, %s1554_s14 }
 0x104   : > { %p1557_p2 = pneg %p1556_p1  ;;  %p1563_p6 = por %p1562_p5, %p1561_p3 }
 0x106   : > { %p1564_p7 = pnand %p1563_p6, %p1557_p2 }
 0x108   : > { %1567 = shalt.err (!%p1564_p7)
}
 0x109   : > { %s1568_s27 = scalar_lea.hbm %s1976_s0, 128  ;;  %s1572_s16 = scalar_lea.hbm %s2183_s5, 256 }
 0x10a   : > { %p1569_p9 = scmp.ne.s32.totalorder %s1976_s0, %s1568_s27  ;;  %p1573_p12 = scmp.lt.s32.totalorder %s1976_s0, %s2183_s5 }
 0x10b   : > { %p1574_p13 = scmp.lt.s32.totalorder %s1572_s16, %s1568_s27 }
 0x10c   : > { %p1570_p10 = pnand %p1569_p9, %p1854_p4 }
 0x10d   : > { %p1575_p0 = por %p1574_p13, %p1573_p12 }
 0x10e   : > { %p1571_p11 = pneg %p1570_p10 }
 0x110   : > { %p1576_p1 = pnand %p1575_p0, %p1571_p11 }
 0x112   : > { %1579 = shalt.err (!%p1576_p1)
}
 0x113   : > { %1443 = dma.vmem_to_hbm [thread:$0]  (%p1854_p4), %s1978_s12, 128, %s1976_s0, %s992_s3   ;;  %v1427_v31 = vpop.f32.mrf.mxu0  ;;  %v1432_v32 = vpop.f32.mrf.mxu1 }
 0x114   : > { %s2036_s15 = scalar_lea.hbm %s2185_s7, %s1955_s29  ;;  %s2042_s17 = scalar_lea.hbm %s2187_s9, %s1955_s29  ;;  %v836_v33 = vpop.permute.xlu0 %835  ;;  %v915_v34 = vpop.permute.xlu1 %914 }
 0x115   : > { %s2218_s30 = scalar_lea.vmem [#allocation6], %s1940_s21  ;;  %s2219_s16 = scalar_lea.vmem [#allocation7], %s1940_s21  ;;  %v907_v35 = vpop.f32.mrf.mxu0  ;;  %v986_v36 = vpop.f32.mrf.mxu1 }
 0x116   : > { %749 = vst [vmem:[%s2218_s30] sm:$0xff] %v746_v29  ;;  %832 = vst [vmem:[%s2219_s16] sm:$0xff] %v829_v30  ;;  %s2198_s0 = scalar_lea.vmem [#allocation10], %s1940_s21  ;;  %s1007_s3 = scalar_lea.sflag [#allocation8], %s1950_s28 }
 0x117   : > { %s2051_s12 = sshll.u32 %s2198_s0, 4  ;;  %s1580_s11 = scalar_lea.vmem %s1986_s24, 128  ;;  %s2105_s12 = int_to_ptr.vmem [resolvable:$true] %s2051_s12 }
 0x118   : > { %p1581_p2 = scmp.ne.s32.totalorder %s1986_s24, %s1580_s11  ;;  %s1753_s4 = smov [#allocation7]  }
 0x119   : > { %s1584_s14 = sshll.u32 %s1753_s4, 4  ;;  %s1585_s14 = int_to_ptr.vmem [resolvable:$false] %s1584_s14 }
 0x11a   : > { %p1582_p3 = pnand %p1581_p2, %p1854_p4  ;;  %s1586_s19 = scalar_lea.vmem %s1585_s14, 256 }
 0x11b   : > { %p1587_p6 = scmp.lt.s32.totalorder %s1986_s24, %s1585_s14  ;;  %p1588_p7 = scmp.lt.s32.totalorder %s1586_s19, %s1580_s11 }
 0x11c   : > { %p1583_p5 = pneg %p1582_p3 }
 0x11d   : > { %p1589_p9 = por %p1588_p7, %p1587_p6 }
 0x11f   : > { %p1590_p10 = pnand %p1589_p9, %p1583_p5 }
 0x121   : > { %1593 = shalt.err (!%p1590_p10)
}
 0x122   : > { %s1594_s1 = scalar_lea.hbm %s1984_s2, 128  ;;  %s1598_s16 = scalar_lea.hbm %s2186_s8, 256 }
 0x123   : > { %p1595_p11 = scmp.ne.s32.totalorder %s1984_s2, %s1594_s1  ;;  %p1599_p0 = scmp.lt.s32.totalorder %s1984_s2, %s2186_s8 }
 0x124   : > { %p1600_p1 = scmp.lt.s32.totalorder %s1598_s16, %s1594_s1 }
 0x125   : > { %p1596_p12 = pnand %p1595_p11, %p1854_p4 }
 0x126   : > { %p1601_p2 = por %p1600_p1, %p1599_p0 }
 0x127   : > { %p1597_p13 = pneg %p1596_p12 }
 0x129   : > { %p1602_p3 = pnand %p1601_p2, %p1597_p13 }
 0x12b   : > { %1605 = shalt.err (!%p1602_p3)
}
 0x12c   : > { %1446 = dma.vmem_to_hbm [thread:$0]  (%p1854_p4), %s1986_s24, 128, %s1984_s2, %s1007_s3   ;;  %v908_v37 = vadd.f32 %v907_v35, %v836_v33  ;;  %v987_v38 = vadd.f32 %v986_v36, %v915_v34 }
 0x12d   : > { %s1606_s11 = scalar_lea.vmem %s1952_s26, 128  ;;  %s1754_s0 = smov [#allocation6]  }
 0x12e   : > { %p1607_p5 = scmp.ne.s32.totalorder %s1952_s26, %s1606_s11  ;;  %s1610_s14 = sshll.u32 %s1754_s0, 4  ;;  %s1611_s14 = int_to_ptr.vmem [resolvable:$false] %s1610_s14 }
 0x12f   : > { %s1612_s19 = scalar_lea.vmem %s1611_s14, 256  ;;  %p1613_p9 = scmp.lt.s32.totalorder %s1952_s26, %s1611_s14 }
 0x130   : > { %p1608_p6 = pnand %p1607_p5, %p1854_p4  ;;  %p1614_p10 = scmp.lt.s32.totalorder %s1612_s19, %s1606_s11 }
 0x132   : > { %p1609_p7 = pneg %p1608_p6  ;;  %p1615_p11 = por %p1614_p10, %p1613_p9 }
 0x134   : > { %p1616_p12 = pnand %p1615_p11, %p1609_p7 }
 0x136   : > { %1619 = shalt.err (!%p1616_p12)
}
 0x137   : > { %s1620_s2 = scalar_lea.hbm %s2036_s15, 128  ;;  %s1624_s27 = scalar_lea.hbm %s2185_s7, 256 }
 0x138   : > { %p1621_p13 = scmp.ne.s32.totalorder %s2036_s15, %s1620_s2  ;;  %p1625_p2 = scmp.lt.s32.totalorder %s2036_s15, %s2185_s7 }
 0x139   : > { %p1626_p3 = scmp.lt.s32.totalorder %s1624_s27, %s1620_s2 }
 0x13a   : > { %p1622_p0 = pnand %p1621_p13, %p1854_p4 }
 0x13b   : > { %p1627_p5 = por %p1626_p3, %p1625_p2 }
 0x13c   : > { %p1623_p1 = pneg %p1622_p0 }
 0x13e   : > { %p1628_p6 = pnand %p1627_p5, %p1623_p1 }
 0x140   : > { %1631 = shalt.err (!%p1628_p6)
}
 0x141   : > { %s2220_s4 = scalar_lea.sflag [#allocation5], %s1950_s28  ;;  %v1437_v39 = vpop.f32.mrf.mxu0  ;;  %v1442_v40 = vpop.f32.mrf.mxu1  ;;  %s2102_s14 = scalar_lea.hbm %s2188_s10, %s1955_s29 }
 0x142   : > { %1445 = dma.vmem_to_hbm [thread:$0]  (%p1854_p4), %s1952_s26, 128, %s2036_s15, %s2220_s4  }
 0x143   : > { %s2221_s19 = scalar_lea.vmem [#allocation9], %s1940_s21  ;;  %s2222_s2 = scalar_lea.vmem [#allocation10], %s1940_s21 }
 0x144   : > { %911 = vst [vmem:[%s2221_s19] sm:$0xff] %v908_v37  ;;  %990 = vst [vmem:[%s2222_s2] sm:$0xff] %v987_v38  ;;  %s1632_s24 = scalar_lea.vmem %s1958_s22, 128  ;;  %s1755_s1 = smov [#allocation9]  }
 0x145   : > { %p1633_p7 = scmp.ne.s32.totalorder %s1958_s22, %s1632_s24  ;;  %s1636_s26 = sshll.u32 %s1755_s1, 4  ;;  %s1637_s26 = int_to_ptr.vmem [resolvable:$false] %s1636_s26 }
 0x146   : > { %s1638_s15 = scalar_lea.vmem %s1637_s26, 256  ;;  %p1639_p11 = scmp.lt.s32.totalorder %s1958_s22, %s1637_s26 }
 0x147   : > { %p1634_p9 = pnand %p1633_p7, %p1854_p4  ;;  %p1640_p12 = scmp.lt.s32.totalorder %s1638_s15, %s1632_s24 }
 0x149   : > { %p1635_p10 = pneg %p1634_p9  ;;  %p1641_p13 = por %p1640_p12, %p1639_p11 }
 0x14b   : > { %p1642_p0 = pnand %p1641_p13, %p1635_p10 }
 0x14d   : > { %1645 = shalt.err (!%p1642_p0)
}
 0x14e   : > { %s1646_s21 = scalar_lea.hbm %s2042_s17, 128  ;;  %s1650_s30 = scalar_lea.hbm %s2187_s9, 256 }
 0x14f   : > { %p1647_p1 = scmp.ne.s32.totalorder %s2042_s17, %s1646_s21  ;;  %p1651_p5 = scmp.lt.s32.totalorder %s2042_s17, %s2187_s9 }
 0x150   : > { %p1652_p6 = scmp.lt.s32.totalorder %s1650_s30, %s1646_s21 }
 0x151   : > { %p1648_p2 = pnand %p1647_p1, %p1854_p4 }
 0x152   : > { %p1653_p7 = por %p1652_p6, %p1651_p5 }
 0x153   : > { %p1649_p3 = pneg %p1648_p2 }
 0x155   : > { %p1654_p9 = pnand %p1653_p7, %p1649_p3 }
 0x157   : > { %1657 = shalt.err (!%p1654_p9)
}
 0x158   : > { %1447 = dma.vmem_to_hbm [thread:$0]  (%p1854_p4), %s1958_s22, 128, %s2042_s17, %s1007_s3  }
 0x159   : > { %s1017_s11 = scalar_lea.sflag [#allocation11], %s1937_s20  ;;  %s1658_s0 = scalar_lea.vmem %s2105_s12, 128 }
 0x15a   : > { %p1659_p10 = scmp.ne.s32.totalorder %s2105_s12, %s1658_s0  ;;  %s1756_s19 = smov [#allocation10]  }
 0x15b   : > { %s1662_s2 = sshll.u32 %s1756_s19, 4  ;;  %s1663_s2 = int_to_ptr.vmem [resolvable:$false] %s1662_s2 }
 0x15c   : > { %p1660_p11 = pnand %p1659_p10, %p1854_p4  ;;  %s1664_s24 = scalar_lea.vmem %s1663_s2, 256 }
 0x15d   : > { %p1665_p13 = scmp.lt.s32.totalorder %s2105_s12, %s1663_s2  ;;  %p1666_p0 = scmp.lt.s32.totalorder %s1664_s24, %s1658_s0 }
 0x15e   : > { %p1661_p12 = pneg %p1660_p11 }
 0x15f   : > { %p1667_p1 = por %p1666_p0, %p1665_p13 }
 0x161   : > { %p1668_p2 = pnand %p1667_p1, %p1661_p12 }
 0x163   : > { %1671 = shalt.err (!%p1668_p2)
}
 0x164   : > { %s1672_s22 = scalar_lea.hbm %s2102_s14, 128  ;;  %s1676_s17 = scalar_lea.hbm %s2188_s10, 256 }
 0x165   : > { %p1673_p3 = scmp.ne.s32.totalorder %s2102_s14, %s1672_s22  ;;  %p1677_p7 = scmp.lt.s32.totalorder %s2102_s14, %s2188_s10 }
 0x166   : > { %p1678_p9 = scmp.lt.s32.totalorder %s1676_s17, %s1672_s22 }
 0x167   : > { %p1674_p5 = pnand %p1673_p3, %p1854_p4 }
 0x168   : > { %p1679_p10 = por %p1678_p9, %p1677_p7 }
 0x169   : > { %p1675_p6 = pneg %p1674_p5 }
 0x16b   : > { %p1680_p11 = pnand %p1679_p10, %p1675_p6 }
 0x16d   : > { %1683 = shalt.err (!%p1680_p11)
}
 0x16e   : > { %1448 = dma.vmem_to_hbm [thread:$0]  (%p1854_p4), %s2105_s12, 128, %s2102_s14, %s1017_s11  }
 0x16f PF: > { %p1474_p12 = scmp.ge.s32.totalorder %s1746_s18, 2  ;;  %s1113_s26 = sand.u32 1, %s1726_s13  }
 0x170   : > { %s1114_s15 = scalar_lea.sflag [#allocation3], %s1113_s26 }
 0x171   : > { %p1456_p13 = pnand %p1474_p12, %p1863_p8 }
 0x173   : > { %p1457_p0 = pneg %p1456_p13 }
 0x175   : > { %1709 = dma.done.wait (%p1457_p0), %s1114_s15, 128  }
 0x176   : > { %1711 = vsyncadd (%p1457_p0), %s1114_s15, 4294967168  ;;  %s2223_s21 = sadd.s32 4294967294, %s1746_s18  }
 0x177   : > { %s1122_s29 = sand.u32 1, %s2223_s21  }
 0x178   : > { %s1123_s27 = scalar_lea.sflag [#allocation5], %s1122_s29 }
 0x179   : > { %1713 = dma.done.wait (%p1457_p0), %s1123_s27, 256  }
 0x17a   : > { %1715 = vsyncadd (%p1457_p0), %s1123_s27, 4294967040  ;;  %s1141_s23 = scalar_lea.sflag [#allocation8], %s1122_s29 }
 0x17b   : > { %1717 = dma.done.wait (%p1457_p0), %s1141_s23, 256  }
 0x17c   : > { %1719 = vsyncadd (%p1457_p0), %s1141_s23, 4294967040  ;;  %s1159_s12 = scalar_lea.sflag [#allocation11], %s1113_s26 }
 0x17d   : > { %1721 = dma.done.wait (%p1457_p0), %s1159_s12, 128  }
 0x17e   : > { %1723 = vsyncadd (%p1457_p0), %s1159_s12, 4294967168  ;;  %s33_s18 = sadd.s32 1, %s1746_s18   ;;  %s2224_s13 = sld [smem:[#allocation16_spill]] }
 0x17f   : > { %p30_p4 = scmp.ge.s32.totalorder %s33_s18, 4   ;;  %s2225_s14 = sld [smem:[#allocation17_spill]] }
 0x180   : > { %s2226_s15 = sld [smem:[#allocation20_spill]] }
 0x181   : > { %s2227_s16 = sld [smem:[#allocation18_spill]]  ;;  %32 = sbr.rel (!%p30_p4) target bundleno = 16 (0x10), region = 162 }
 0x182   : > { %s2228_s17 = sld [smem:[#allocation19_spill]] }
 0x186   :  { %1164 = vsyncpa [#allocation3], 1 }
 0x187   :  { %1166 = vsyncpa [#allocation3 + $0x1], 1 }
 0x188   :  { %1167 = vsyncpa [#allocation5], 1 }
 0x189   :  { %1169 = vsyncpa [#allocation5 + $0x1], 1 }
 0x18a   :  { %1170 = vsyncpa [#allocation8], 1 }
 0x18b   :  { %1172 = vsyncpa [#allocation8 + $0x1], 1 }
 0x18c   :  { %1173 = vsyncpa [#allocation11], 1 }
 0x18d   :  { %1175 = vsyncpa [#allocation11 + $0x1], 1 }

</bundles_post_ra>
